<compile_context>
chip_gen: v5e
topology: v5e:2x2
jax: 0.10.0
libtpu: 0.0.40
codegen_flags: <defaults>
</compile_context>

<pallas_src>
import jax
import jax.numpy as jnp
from jax.experimental import pallas as pl
from jax.experimental.pallas import tpu as pltpu


def _window_mlp_kernel(ids_ref, a_ref, b1_ref, w2_ref, b2_ref, o_ref):
    # ids_ref: (W, TM)    int32  window offset on sublanes, rows on lanes
    # a_ref:   (W, H, V)  f32    A[k] = (emb @ w1[k*E:(k+1)*E, :]).T
    # b1_ref:  (H, 1)     f32
    # w2_ref:  (H, 1)     f32
    # b2_ref:  (1, 1)     f32    SMEM scalar
    # o_ref:   (1, TM)    f32    lane-dense sigmoid probabilities
    W = ids_ref.shape[0]
    V = a_ref.shape[2]
    tm = o_ref.shape[1]

    ids = ids_ref[...]                                              # (W, TM)
    vocab_iota = jax.lax.broadcasted_iota(jnp.int32, (V, tm), 0)    # (V, TM)

    # Fused embedding gather + Linear(W*E -> H):
    #   hidden[:, m] = sum_k (emb @ w1_k).T[:, ids[k, m]] + b1
    acc = None
    for k in range(W):
        onehot = (ids[k:k + 1, :] == vocab_iota).astype(jnp.float32)          # (V, TM)
        part = jnp.dot(a_ref[k], onehot, preferred_element_type=jnp.float32)  # (H, TM)
        acc = part if acc is None else acc + part
    hidden = acc + b1_ref[...]                                      # (H, TM) + (H, 1)

    # Linear(H -> 1) as VPU multiply + cross-sublane reduction (lane-dense result)
    logit = jnp.sum(hidden * w2_ref[...], axis=0, keepdims=True) + b2_ref[0, 0]
    o_ref[...] = jax.nn.sigmoid(logit)                              # (1, TM)


def word_window_classifier_forward(inputs, emb, w1, b1, w2, b2, *,
                                   window_size, tm=1024):
    """inputs: (B, L0) int token ids. Returns (B, L) float32 probabilities."""
    W = 2 * window_size + 1
    B, L0 = inputs.shape
    L = L0 - W + 1
    V, E = emb.shape
    D, H = w1.shape
    assert D == W * E
    M = B * L

    # unfold(dim=1, size=W, step=1): (B, L0) -> (B, L, W) token-id windows,
    # transposed so the B*L rows land on the 128-lane axis: (W, M).
    win_idx = jnp.arange(L)[:, None] + jnp.arange(W)[None, :]        # (L, W)
    ids = inputs[:, win_idx].astype(jnp.int32).reshape(M, W).T       # (W, M)

    # Per-window-offset projection tables: A[k] = (emb @ w1[k*E:(k+1)*E, :]).T
    a = jnp.einsum('keh,ve->khv', w1.reshape(W, E, H), emb,
                   precision=jax.lax.Precision.HIGHEST).astype(jnp.float32)  # (W, H, V)

    b1_col = jnp.reshape(b1, (H, 1)).astype(jnp.float32)
    w2_col = jnp.reshape(w2, (H, 1)).astype(jnp.float32)
    b2_s = jnp.reshape(b2, (1, 1)).astype(jnp.float32)

    # Row tiling: tm is a multiple of 128; pad M with the pad token (id 0).
    tm_eff = max(128, min(tm, ((M + 127) // 128) * 128))
    num_tiles = pl.cdiv(M, tm_eff)
    m_pad = num_tiles * tm_eff
    if m_pad != M:
        ids = jnp.pad(ids, ((0, 0), (0, m_pad - M)))                 # pad_ix = 0

    out = pl.pallas_call(
        _window_mlp_kernel,
        out_shape=jax.ShapeDtypeStruct((1, m_pad), jnp.float32),
        grid_spec=pltpu.PrefetchScalarGridSpec(
            num_scalar_prefetch=0,
            grid=(num_tiles,),
            in_specs=[
                pl.BlockSpec((W, tm_eff), lambda i: (0, i)),          # ids: streamed
                pl.BlockSpec((W, H, V), lambda i: (0, 0, 0)),         # tables: resident
                pl.BlockSpec((H, 1), lambda i: (0, 0)),               # b1: resident
                pl.BlockSpec((H, 1), lambda i: (0, 0)),               # w2: resident
                pl.BlockSpec(memory_space=pltpu.MemorySpace.SMEM),    # b2: SMEM scalar
            ],
            out_specs=pl.BlockSpec((1, tm_eff), lambda i: (0, i)),    # lane-dense out
        ),
        compiler_params=pltpu.CompilerParams(
            dimension_semantics=("parallel",)),
    )(ids, a, b1_col, w2_col, b2_s)

    return out[0, :M].reshape(B, L)


if __name__ == "__main__":
    # hyperparameters consistent with the module (small demo shapes)
    window_size = 2
    W = 2 * window_size + 1              # full window = 5
    embedded_dim = 8
    hidden_dim = 32
    vocab_size = 64
    pad_ix = 0
    B, L0 = 2, 12                        # -> L = 8, M = B*L = 16
    D = W * embedded_dim                 # 40

    key = jax.random.PRNGKey(0)
    k_emb, k_w1, k_b1, k_w2, k_b2, k_in = jax.random.split(key, 6)

    # nn.Embedding init: N(0,1) with padding row zeroed (padding_idx=0)
    emb = jax.random.normal(k_emb, (vocab_size, embedded_dim), dtype=jnp.float32)
    emb = emb.at[pad_ix].set(0.0)

    # nn.Linear init: U(-1/sqrt(fan_in), 1/sqrt(fan_in)); stored as (in, out)
    bound1 = 1.0 / (D ** 0.5)
    w1 = jax.random.uniform(k_w1, (D, hidden_dim), jnp.float32, -bound1, bound1)
    b1 = jax.random.uniform(k_b1, (hidden_dim,), jnp.float32, -bound1, bound1)
    bound2 = 1.0 / (hidden_dim ** 0.5)
    w2 = jax.random.uniform(k_w2, (hidden_dim, 1), jnp.float32, -bound2, bound2)
    b2 = jax.random.uniform(k_b2, (1, 1), jnp.float32, -bound2, bound2)

    inputs = jax.random.randint(k_in, (B, L0), 0, vocab_size, dtype=jnp.int32)

    out = word_window_classifier_forward(
        inputs, emb, w1, b1, w2, b2, window_size=window_size)
    out = jax.block_until_ready(out)

    # Pure-JAX reference of the literal module forward:
    # embed -> view -> Linear -> Linear -> Sigmoid (no hidden nonlinearity).
    L = L0 - W + 1
    win_idx = jnp.arange(L)[:, None] + jnp.arange(W)[None, :]
    x_ref = emb[inputs[:, win_idx]].reshape(B, L, D)
    hp = jax.lax.Precision.HIGHEST
    h_ref = jnp.einsum('bld,dh->blh', x_ref, w1, precision=hp) + b1
    logit_ref = jnp.einsum('blh,ho->blo', h_ref, w2, precision=hp)[..., 0] + b2[0, 0]
    ref = jax.nn.sigmoid(logit_ref)

    assert out.shape == (B, L)
    max_err = float(jnp.max(jnp.abs(out - ref)))
    # tolerance covers MXU accumulation-order / multi-pass f32 differences
    assert max_err < 2e-3, f"mismatch vs reference: max |err| = {max_err}"

    print("KERNEL_OK")
</pallas_src>

<mosaic_0001>
module attributes {stable_mosaic.version = 11 : i64} {
  func.func @_window_mlp_kernel(%arg0: i32, %arg1: memref<5x128xi32, #tpu.memory_space<vmem>>, %arg2: memref<5x32x64xf32, #tpu.memory_space<vmem>>, %arg3: memref<32x1xf32, #tpu.memory_space<vmem>>, %arg4: memref<32x1xf32, #tpu.memory_space<vmem>>, %arg5: memref<1x1xf32, #tpu.memory_space<smem>>, %arg6: memref<1x128xf32, #tpu.memory_space<vmem>>) attributes {dimension_semantics = [#tpu.dimension_semantics<parallel>], iteration_bounds = array<i64: 1>, scalar_prefetch = 0 : i64, scratch_operands = 0 : i64, tpu.core_type = #tpu.core_type<tc>, window_params = [{transform_indices = @transform_0, window_bounds = array<i64: 5, 128>}, {pipeline_mode = #tpu.pipeline_mode<synchronous>, transform_indices = @transform_1, window_bounds = array<i64: 5, 32, 64>}, {pipeline_mode = #tpu.pipeline_mode<synchronous>, transform_indices = @transform_2, window_bounds = array<i64: 32, 1>}, {pipeline_mode = #tpu.pipeline_mode<synchronous>, transform_indices = @transform_3, window_bounds = array<i64: 32, 1>}, {transform_indices = @transform_4, window_bounds = array<i64: 1, 1>}, {transform_indices = @transform_5, window_bounds = array<i64: 1, 128>}]} {
    %c0 = arith.constant 0 : index
    %c0_0 = arith.constant 0 : index
    %0 = vector.load %arg1[%c0, %c0_0] : memref<5x128xi32, #tpu.memory_space<vmem>>, vector<5x128xi32>
    %1 = tpu.iota {dimensions = array<i32: 0>} : vector<64x128xi32>
    %2 = vector.extract_strided_slice %0 {offsets = [0, 0], sizes = [1, 128], strides = [1, 1]} : vector<5x128xi32> to vector<1x128xi32>
    %3 = vector.broadcast %2 : vector<1x128xi32> to vector<64x128xi32>
    %4 = arith.cmpi eq, %3, %1 : vector<64x128xi32>
    %5 = arith.extui %4 : vector<64x128xi1> to vector<64x128xi32>
    %6 = arith.sitofp %5 : vector<64x128xi32> to vector<64x128xf32>
    %c0_1 = arith.constant 0 : index
    %c0_2 = arith.constant 0 : index
    %c0_3 = arith.constant 0 : index
    %7 = vector.load %arg2[%c0_1, %c0_2, %c0_3] : memref<5x32x64xf32, #tpu.memory_space<vmem>>, vector<1x32x64xf32>
    %8 = vector.shape_cast %7 : vector<1x32x64xf32> to vector<32x64xf32>
    %cst = arith.constant dense<0.000000e+00> : vector<32x128xf32>
    %9 = tpu.matmul %8, %6, %cst {dimension_numbers = #tpu.dot_dimension_numbers<[1], [0], [0], [1], [0, 0, 1, 1], [], []>} : vector<32x64xf32>, vector<64x128xf32>, vector<32x128xf32> -> vector<32x128xf32>
    %10 = vector.extract_strided_slice %0 {offsets = [1, 0], sizes = [1, 128], strides = [1, 1]} : vector<5x128xi32> to vector<1x128xi32>
    %11 = vector.broadcast %10 : vector<1x128xi32> to vector<64x128xi32>
    %12 = arith.cmpi eq, %11, %1 : vector<64x128xi32>
    %13 = arith.extui %12 : vector<64x128xi1> to vector<64x128xi32>
    %14 = arith.sitofp %13 : vector<64x128xi32> to vector<64x128xf32>
    %c1 = arith.constant 1 : index
    %c0_4 = arith.constant 0 : index
    %c0_5 = arith.constant 0 : index
    %15 = vector.load %arg2[%c1, %c0_4, %c0_5] : memref<5x32x64xf32, #tpu.memory_space<vmem>>, vector<1x32x64xf32>
    %16 = vector.shape_cast %15 : vector<1x32x64xf32> to vector<32x64xf32>
    %cst_6 = arith.constant dense<0.000000e+00> : vector<32x128xf32>
    %17 = tpu.matmul %16, %14, %cst_6 {dimension_numbers = #tpu.dot_dimension_numbers<[1], [0], [0], [1], [0, 0, 1, 1], [], []>} : vector<32x64xf32>, vector<64x128xf32>, vector<32x128xf32> -> vector<32x128xf32>
    %18 = arith.addf %9, %17 : vector<32x128xf32>
    %19 = vector.extract_strided_slice %0 {offsets = [2, 0], sizes = [1, 128], strides = [1, 1]} : vector<5x128xi32> to vector<1x128xi32>
    %20 = vector.broadcast %19 : vector<1x128xi32> to vector<64x128xi32>
    %21 = arith.cmpi eq, %20, %1 : vector<64x128xi32>
    %22 = arith.extui %21 : vector<64x128xi1> to vector<64x128xi32>
    %23 = arith.sitofp %22 : vector<64x128xi32> to vector<64x128xf32>
    %c2 = arith.constant 2 : index
    %c0_7 = arith.constant 0 : index
    %c0_8 = arith.constant 0 : index
    %24 = vector.load %arg2[%c2, %c0_7, %c0_8] : memref<5x32x64xf32, #tpu.memory_space<vmem>>, vector<1x32x64xf32>
    %25 = vector.shape_cast %24 : vector<1x32x64xf32> to vector<32x64xf32>
    %cst_9 = arith.constant dense<0.000000e+00> : vector<32x128xf32>
    %26 = tpu.matmul %25, %23, %cst_9 {dimension_numbers = #tpu.dot_dimension_numbers<[1], [0], [0], [1], [0, 0, 1, 1], [], []>} : vector<32x64xf32>, vector<64x128xf32>, vector<32x128xf32> -> vector<32x128xf32>
    %27 = arith.addf %18, %26 : vector<32x128xf32>
    %28 = vector.extract_strided_slice %0 {offsets = [3, 0], sizes = [1, 128], strides = [1, 1]} : vector<5x128xi32> to vector<1x128xi32>
    %29 = vector.broadcast %28 : vector<1x128xi32> to vector<64x128xi32>
    %30 = arith.cmpi eq, %29, %1 : vector<64x128xi32>
    %31 = arith.extui %30 : vector<64x128xi1> to vector<64x128xi32>
    %32 = arith.sitofp %31 : vector<64x128xi32> to vector<64x128xf32>
    %c3 = arith.constant 3 : index
    %c0_10 = arith.constant 0 : index
    %c0_11 = arith.constant 0 : index
    %33 = vector.load %arg2[%c3, %c0_10, %c0_11] : memref<5x32x64xf32, #tpu.memory_space<vmem>>, vector<1x32x64xf32>
    %34 = vector.shape_cast %33 : vector<1x32x64xf32> to vector<32x64xf32>
    %cst_12 = arith.constant dense<0.000000e+00> : vector<32x128xf32>
    %35 = tpu.matmul %34, %32, %cst_12 {dimension_numbers = #tpu.dot_dimension_numbers<[1], [0], [0], [1], [0, 0, 1, 1], [], []>} : vector<32x64xf32>, vector<64x128xf32>, vector<32x128xf32> -> vector<32x128xf32>
    %36 = arith.addf %27, %35 : vector<32x128xf32>
    %37 = vector.extract_strided_slice %0 {offsets = [4, 0], sizes = [1, 128], strides = [1, 1]} : vector<5x128xi32> to vector<1x128xi32>
    %38 = vector.broadcast %37 : vector<1x128xi32> to vector<64x128xi32>
    %39 = arith.cmpi eq, %38, %1 : vector<64x128xi32>
    %40 = arith.extui %39 : vector<64x128xi1> to vector<64x128xi32>
    %41 = arith.sitofp %40 : vector<64x128xi32> to vector<64x128xf32>
    %c4 = arith.constant 4 : index
    %c0_13 = arith.constant 0 : index
    %c0_14 = arith.constant 0 : index
    %42 = vector.load %arg2[%c4, %c0_13, %c0_14] : memref<5x32x64xf32, #tpu.memory_space<vmem>>, vector<1x32x64xf32>
    %43 = vector.shape_cast %42 : vector<1x32x64xf32> to vector<32x64xf32>
    %cst_15 = arith.constant dense<0.000000e+00> : vector<32x128xf32>
    %44 = tpu.matmul %43, %41, %cst_15 {dimension_numbers = #tpu.dot_dimension_numbers<[1], [0], [0], [1], [0, 0, 1, 1], [], []>} : vector<32x64xf32>, vector<64x128xf32>, vector<32x128xf32> -> vector<32x128xf32>
    %45 = arith.addf %36, %44 : vector<32x128xf32>
    %c0_16 = arith.constant 0 : index
    %c0_17 = arith.constant 0 : index
    %46 = vector.load %arg3[%c0_16, %c0_17] : memref<32x1xf32, #tpu.memory_space<vmem>>, vector<32x1xf32>
    %47 = vector.broadcast %46 : vector<32x1xf32> to vector<32x128xf32>
    %48 = arith.addf %45, %47 : vector<32x128xf32>
    %c0_18 = arith.constant 0 : index
    %c0_19 = arith.constant 0 : index
    %49 = vector.load %arg4[%c0_18, %c0_19] : memref<32x1xf32, #tpu.memory_space<vmem>>, vector<32x1xf32>
    %50 = vector.broadcast %49 : vector<32x1xf32> to vector<32x128xf32>
    %51 = arith.mulf %48, %50 : vector<32x128xf32>
    %cst_20 = arith.constant dense<0.000000e+00> : vector<128xf32>
    %52 = vector.multi_reduction <add>, %51, %cst_20 [0] : vector<32x128xf32> to vector<128xf32>
    %53 = vector.shape_cast %52 : vector<128xf32> to vector<1x128xf32>
    %c0_21 = arith.constant 0 : index
    %c0_22 = arith.constant 0 : index
    %54 = memref.load %arg5[%c0_21, %c0_22] : memref<1x1xf32, #tpu.memory_space<smem>>
    %55 = vector.broadcast %54 : f32 to vector<1x128xf32>
    %56 = arith.addf %53, %55 : vector<1x128xf32>
    %57 = arith.negf %56 : vector<1x128xf32>
    %58 = math.exp %57 : vector<1x128xf32>
    %cst_23 = arith.constant 1.000000e+00 : f32
    %59 = vector.broadcast %cst_23 : f32 to vector<1x128xf32>
    %60 = arith.addf %59, %58 : vector<1x128xf32>
    %61 = arith.divf %59, %60 : vector<1x128xf32>
    %c0_24 = arith.constant 0 : index
    %c0_25 = arith.constant 0 : index
    %62 = vector.load %arg6[%c0_24, %c0_25] : memref<1x128xf32, #tpu.memory_space<vmem>>, vector<1x128xf32>
    tpu.vector_store %arg6[%c0_24, %c0_25], %61 {strides = array<i32>} : memref<1x128xf32, #tpu.memory_space<vmem>>, vector<1x128xf32>,
    return
  }
  func.func @transform_0(%arg0: i32) -> (i32, i32) {
    %c0_i32 = arith.constant 0 : i32
    %c0_i32_0 = arith.constant 0 : i32
    return %c0_i32, %arg0 : i32, i32
  }
  func.func @transform_1(%arg0: i32) -> (i32, i32, i32) {
    %c0_i32 = arith.constant 0 : i32
    %c0_i32_0 = arith.constant 0 : i32
    %c0_i32_1 = arith.constant 0 : i32
    %c0_i32_2 = arith.constant 0 : i32
    return %c0_i32, %c0_i32_0, %c0_i32_1 : i32, i32, i32
  }
  func.func @transform_2(%arg0: i32) -> (i32, i32) {
    %c0_i32 = arith.constant 0 : i32
    %c0_i32_0 = arith.constant 0 : i32
    %c0_i32_1 = arith.constant 0 : i32
    return %c0_i32, %c0_i32_0 : i32, i32
  }
  func.func @transform_3(%arg0: i32) -> (i32, i32) {
    %c0_i32 = arith.constant 0 : i32
    %c0_i32_0 = arith.constant 0 : i32
    %c0_i32_1 = arith.constant 0 : i32
    return %c0_i32, %c0_i32_0 : i32, i32
  }
  func.func @transform_4(%arg0: i32) -> (i32, i32) {
    %c0_i32 = arith.constant 0 : i32
    %c0_i32_0 = arith.constant 0 : i32
    %c0_i32_1 = arith.constant 0 : i32
    return %c0_i32, %c0_i32_0 : i32, i32
  }
  func.func @transform_5(%arg0: i32) -> (i32, i32) {
    %c0_i32 = arith.constant 0 : i32
    %c0_i32_0 = arith.constant 0 : i32
    return %c0_i32, %arg0 : i32, i32
  }
}

</mosaic_0001>

<bundles_post_ra>
// kernel: tpu_custom_call.1
= control target key start
LH: loop header
LB: loop body
LE: loop exit
PB: predicated region body
PF: predicated region fallthrough
CT: control target
= control target key end

     0   :  { %11 = vsyncpa [#allocation4], 0  ;;  %s999_s0 = inlined_call_operand.vmem [shape: s32[5,128], index: 0, kind: input, shape index: {}]   ;;  %s1000_s1 = inlined_call_operand.hbm [shape: f32[5,32,64], index: 1, kind: input, shape index: {}]   ;;  %s1001_s2 = inlined_call_operand.vmem [shape: f32[32,1], index: 2, kind: input, shape index: {}]   ;;  %s1002_s3 = inlined_call_operand.vmem [shape: f32[32,1], index: 3, kind: input, shape index: {}]   ;;  %s1003_s4 = inlined_call_operand.<no memory space> [shape: f32[1,1], index: 4, kind: input, shape index: {}]   ;;  %s1004_s5 = inlined_call_operand.hbm [shape: f32[1,128], index: 5, kind: output, shape index: {}]  }
   0x1   :  { %12 = vsyncpa [#allocation5], 0  ;;  %s19_s20 = sshll.u32 %s1000_s1, 4  ;;  %s702_s21 = smov [#allocation3]   ;;  %s20_s20 = int_to_ptr.hbm [resolvable:$true] %s19_s20 }
   0x2   :  { %s21_s22 = sshll.u32 %s702_s21, 4  ;;  %s703_s23 = smov 128   ;;  %s22_s22 = int_to_ptr.vmem [resolvable:$true] %s21_s22 }
   0x3   :  { %s704_s24 = smov 8  }
   0x4   :  { %27 = dma.hbm_to_vmem [thread:$0]  %s20_s20, 2560, %s22_s22, [#allocation4], %s703_s23, %s703_s23, %s704_s24  }
   0x5   :  { %698 = dma.done.wait [#allocation4], 2560  }
   0x6   :  { %699 = vsyncadd [#allocation4], 4294964736  ;;  %v39_v0 = vlaneseq  ;;  %v38_v4 = vld [vmem:[%s999_s0] sm:$0x1f]  ;;  %v705_v10 = vmov 1.0   ;;  %v105_v16 = vld [vmem:[#allocation3 + $0x30] sm:$0xff] }
   0x7   :  { %v752_v5 = vperm.slane %v38_v4, 1  ;;  %v757_v7 = vperm.slane %v38_v4, 2  ;;  %v759_v8 = vperm.slane %v38_v4, 3  ;;  %v826_v14 = vperm.slane %v38_v4, 0  ;;  %v103_v17 = vld [vmem:[#allocation3 + $0x20] sm:$0xff]  ;;  %v106_v20 = vld [vmem:[#allocation3 + $0x38] sm:$0xff] }
   0x8   :  { %v741_v1 = vshrl.u32 %v39_v0, 7  ;;  %v834_v15 = vperm.slane %v38_v4, 4  ;;  %v216_v18 = vld [vmem:[#allocation3 + $0x40] sm:$0xff]  ;;  %v104_v21 = vld [vmem:[#allocation3 + $0x28] sm:$0xff]  ;;  %v706_v25 = vmov 0   ;;  %v218_v28 = vld [vmem:[#allocation3 + $0x50] sm:$0xff] }
   0x9   :  { %v291_v19 = vld [vmem:[#allocation3 + $0x60] sm:$0xff]  ;;  %v217_v22 = vld [vmem:[#allocation3 + $0x48] sm:$0xff]  ;;  %643 = vset.pattern.permute.xlu0 %v706_v25  ;;  %v417_v29 = vld [vmem:[%s1001_s2 + $0x10] sm:$0xff]  ;;  %644 = vset.pattern.permute.xlu1 %v706_v25  ;;  %s707_s16 = smov [#allocation6]  }
   0xa   :  { %v744_v2 = vadd.s32 56, %v741_v1  ;;  %v747_v3 = vadd.s32 48, %v741_v1  ;;  %v755_v6 = vadd.s32 40, %v741_v1  ;;  %v766_v9 = vadd.s32 32, %v741_v1  ;;  %v415_v23 = vld [vmem:[%s1001_s2] sm:$0xff]  ;;  %v292_v24 = vld [vmem:[#allocation3 + $0x68] sm:$0xff]  ;;  %431 = vperm.xlu1 %644, %v417_v29   ;;  %645 = vset.pattern.permute.xlu2 %v706_v25 }
   0xb   :  { %v775_v11 = vadd.s32 24, %v741_v1  ;;  %v789_v12 = vadd.s32 16, %v741_v1  ;;  %v804_v13 = vadd.s32 8, %v741_v1  ;;  %v73_v26 = vld [vmem:[#allocation3] sm:$0xff]  ;;  %421 = vperm.xlu0 %643, %v415_v23   ;;  %v444_v30 = vld [vmem:[%s1002_s3 + $0x8] sm:$0xff]  ;;  %v293_v32 = vld [vmem:[#allocation3 + $0x70] sm:$0xff] }
   0xc   :  { %vm85_vm0 = vcmp.eq.s32.totalorder %v752_v5, %v744_v2  ;;  %vm84_vm1 = vcmp.eq.s32.totalorder %v752_v5, %v747_v3  ;;  %vm198_vm2 = vcmp.eq.s32.totalorder %v757_v7, %v744_v2  ;;  %vm83_vm3 = vcmp.eq.s32.totalorder %v752_v5, %v755_v6  ;;  %v366_v27 = vld [vmem:[#allocation3 + $0x80] sm:$0xff]  ;;  %v416_v31 = vld [vmem:[%s1001_s2 + $0x8] sm:$0xff]  ;;  %454 = vperm.xlu2 %645, %v444_v30   ;;  %v219_v35 = vld [vmem:[#allocation3 + $0x58] sm:$0xff]  ;;  %s508_s17 = sshll.u32 %s707_s16, 4  ;;  %s509_s17 = int_to_ptr.vmem [resolvable:$true] %s508_s17 }
   0xd   :  { %621 = vmatpush.msk.msra.mxu1 %vm85_vm0, %v705_v10  ;;  %536 = vmatpush.msk.msra.mxu0 %vm85_vm0, %v705_v10  ;;  %vm197_vm4 = vcmp.eq.s32.totalorder %v757_v7, %v747_v3  ;;  %vm196_vm5 = vcmp.eq.s32.totalorder %v757_v7, %v755_v6  ;;  %vm273_vm6 = vcmp.eq.s32.totalorder %v759_v8, %v744_v2  ;;  %v74_v33 = vld [vmem:[#allocation3 + $0x8] sm:$0xff]  ;;  %v443_v36 = vld [vmem:[%s1002_s3] sm:$0xff]  ;;  %v418_v37 = vld [vmem:[%s1001_s2 + $0x18] sm:$0xff] }
   0xe   :  { %568 = vmatpush.msk.msra.mxu2 %vm198_vm2, %v705_v10  ;;  %vm82_vm7 = vcmp.eq.s32.totalorder %v752_v5, %v766_v9  ;;  %588 = vmatpush.msk.msra.mxu3 %vm273_vm6, %v705_v10  ;;  %vm272_vm8 = vcmp.eq.s32.totalorder %v759_v8, %v747_v3  ;;  %vm195_vm9 = vcmp.eq.s32.totalorder %v757_v7, %v766_v9  ;;  %v367_v34 = vld [vmem:[#allocation3 + $0x88] sm:$0xff]  ;;  %v445_v38 = vld [vmem:[%s1002_s3 + $0x10] sm:$0xff]  ;;  %v294_v39 = vld [vmem:[#allocation3 + $0x78] sm:$0xff] }
   0xf   :  { %622 = vmatpush.msk.msra.mxu1 %vm84_vm1, %v705_v10  ;;  %537 = vmatpush.msk.msra.mxu0 %vm84_vm1, %v705_v10  ;;  %vm271_vm10 = vcmp.eq.s32.totalorder %v759_v8, %v755_v6  ;;  %vm81_vm11 = vcmp.eq.s32.totalorder %v752_v5, %v775_v11  ;;  %vm194_vm12 = vcmp.eq.s32.totalorder %v757_v7, %v775_v11  ;;  %v75_v40 = vld [vmem:[#allocation3 + $0x10] sm:$0xff]  ;;  %v369_v42 = vld [vmem:[#allocation3 + $0x98] sm:$0xff] }
  0x10   :  { %569 = vmatpush.msk.msra.mxu2 %vm197_vm4, %v705_v10  ;;  %589 = vmatpush.msk.msra.mxu3 %vm272_vm8, %v705_v10  ;;  %vm270_vm13 = vcmp.eq.s32.totalorder %v759_v8, %v766_v9  ;;  %vm80_vm14 = vcmp.eq.s32.totalorder %v752_v5, %v789_v12  ;;  %vm193_vm15 = vcmp.eq.s32.totalorder %v757_v7, %v789_v12  ;;  %v368_v41 = vld [vmem:[#allocation3 + $0x90] sm:$0xff]  ;;  %v446_v43 = vld [vmem:[%s1002_s3 + $0x18] sm:$0xff] }
  0x11   :  { %623 = vmatpush.msk.msra.mxu1 %vm83_vm3, %v705_v10  ;;  %538 = vmatpush.msk.msra.mxu0 %vm83_vm3, %v705_v10  ;;  %vm269_vm0 = vcmp.eq.s32.totalorder %v759_v8, %v775_v11  ;;  %vm79_vm1 = vcmp.eq.s32.totalorder %v752_v5, %v804_v13  ;;  %vm192_vm2 = vcmp.eq.s32.totalorder %v757_v7, %v804_v13  ;;  %v76_v44 = vld [vmem:[#allocation3 + $0x18] sm:$0xff] }
  0x12   :  { %570 = vmatpush.msk.msra.mxu2 %vm196_vm5, %v705_v10  ;;  %590 = vmatpush.msk.msra.mxu3 %vm271_vm10, %v705_v10  ;;  %vm268_vm3 = vcmp.eq.s32.totalorder %v759_v8, %v789_v12  ;;  %vm78_vm4 = vcmp.eq.s32.totalorder %v752_v5, %v741_v1  ;;  %vm107_vm5 = vcmask 523264   ;;  %vm56_vm6 = vcmp.eq.s32.totalorder %v826_v14, %v744_v2 }
  0x13   :  { %624 = vmatpush.msk.msra.mxu1 %vm82_vm7, %v705_v10  ;;  %539 = vmatpush.msk.msra.mxu0 %vm82_vm7, %v705_v10  ;;  %vm191_vm7 = vcmp.eq.s32.totalorder %v757_v7, %v741_v1  ;;  %vm348_vm8 = vcmp.eq.s32.totalorder %v834_v15, %v744_v2  ;;  %vm347_vm10 = vcmp.eq.s32.totalorder %v834_v15, %v747_v3 }
  0x14   :  { %571 = vmatpush.msk.msra.mxu2 %vm195_vm9, %v705_v10  ;;  %591 = vmatpush.msk.msra.mxu3 %vm270_vm13, %v705_v10  ;;  %vm55_vm9 = vcmp.eq.s32.totalorder %v826_v14, %v747_v3  ;;  %vm346_vm13 = vcmp.eq.s32.totalorder %v834_v15, %v755_v6 }
  0x15   :  { %625 = vmatpush.msk.msra.mxu1 %vm81_vm11, %v705_v10  ;;  %540 = vmatpush.msk.msra.mxu0 %vm81_vm11, %v705_v10  ;;  %vm267_vm11 = vcmp.eq.s32.totalorder %v759_v8, %v804_v13 }
  0x16   :  { %572 = vmatpush.msk.msra.mxu2 %vm194_vm12, %v705_v10  ;;  %592 = vmatpush.msk.msra.mxu3 %vm269_vm0, %v705_v10  ;;  %vm54_vm12 = vcmp.eq.s32.totalorder %v826_v14, %v755_v6  ;;  %vm345_vm0 = vcmp.eq.s32.totalorder %v834_v15, %v766_v9 }
  0x17   :  { %626 = vmatpush.msk.msra.mxu1 %vm80_vm14, %v705_v10  ;;  %541 = vmatpush.msk.msra.mxu0 %vm80_vm14, %v705_v10  ;;  %vm266_vm14 = vcmp.eq.s32.totalorder %v759_v8, %v741_v1 }
  0x18   :  { %573 = vmatpush.msk.msra.mxu2 %vm193_vm15, %v705_v10  ;;  %593 = vmatpush.msk.msra.mxu3 %vm268_vm3, %v705_v10  ;;  %vm53_vm15 = vcmp.eq.s32.totalorder %v826_v14, %v766_v9  ;;  %vm51_vm3 = vcmp.eq.s32.totalorder %v826_v14, %v789_v12 }
  0x19   :  { %627 = vmatpush.msk.msra.mxu1 %vm79_vm1, %v705_v10  ;;  %542 = vmatpush.msk.msra.mxu0 %vm79_vm1, %v705_v10  ;;  %vm52_vm1 = vcmp.eq.s32.totalorder %v826_v14, %v775_v11 }
  0x1a   :  { %574 = vmatpush.msk.msra.mxu2 %vm192_vm2, %v705_v10  ;;  %594 = vmatpush.msk.msra.mxu3 %vm267_vm11, %v705_v10  ;;  %vm344_vm2 = vcmp.eq.s32.totalorder %v834_v15, %v775_v11 }
  0x1b   :  { %628 = vmatpush.msk.msra.mxu1 %vm78_vm4, %v705_v10  ;;  %543 = vmatpush.msk.msra.mxu0 %vm78_vm4, %v705_v10  ;;  %vm343_vm4 = vcmp.eq.s32.totalorder %v834_v15, %v789_v12 }
  0x1c   :  { %546 = vmatmul.msk.f32.vlgmr.msra.gmra.mxu1 %vm107_vm5, %v105_v16  ;;  %544 = vmatmul.msk.f32.vlgmr.msra.gmra.mxu0 %vm107_vm5, %v103_v17 }
  0x1d   :  { %548 = vmatpush.msk.msrb.mxu1 %vm56_vm6, %v705_v10  ;;  %575 = vmatpush.msk.msra.mxu2 %vm191_vm7, %v705_v10  ;;  %vm50_vm6 = vcmp.eq.s32.totalorder %v826_v14, %v804_v13  ;;  %vm342_vm7 = vcmp.eq.s32.totalorder %v834_v15, %v804_v13 }
  0x1e   :  { %608 = vmatpush.msk.msrb.mxu0 %vm348_vm8, %v705_v10  ;;  %576 = vmatmul.msk.f32.vlgmr.msra.gmra.mxu2 %vm107_vm5, %v216_v18 }
  0x1f   :  { %549 = vmatpush.msk.msrb.mxu1 %vm55_vm9, %v705_v10  ;;  %629 = vmatpush.msk.msrb.mxu2 %vm348_vm8, %v705_v10  ;;  %vm49_vm8 = vcmp.eq.s32.totalorder %v826_v14, %v741_v1  ;;  %vm341_vm9 = vcmp.eq.s32.totalorder %v834_v15, %v741_v1 }
  0x20   :  { %609 = vmatpush.msk.msrb.mxu0 %vm347_vm10, %v705_v10  ;;  %595 = vmatpush.msk.msra.mxu3 %vm266_vm14, %v705_v10 }
  0x21   :  { %550 = vmatpush.msk.msrb.mxu1 %vm54_vm12, %v705_v10  ;;  %630 = vmatpush.msk.msrb.mxu2 %vm347_vm10, %v705_v10 }
  0x22   :  { %610 = vmatpush.msk.msrb.mxu0 %vm346_vm13, %v705_v10  ;;  %596 = vmatmul.msk.f32.vlgmr.msra.gmra.mxu3 %vm107_vm5, %v291_v19 }
  0x23   :  { %551 = vmatpush.msk.msrb.mxu1 %vm53_vm15, %v705_v10  ;;  %631 = vmatpush.msk.msrb.mxu2 %vm346_vm13, %v705_v10 }
  0x24   :  { %547 = vmatmul.msk.f32.gmra.mxu1 %vm107_vm5, %v106_v20  ;;  %611 = vmatpush.msk.msrb.mxu0 %vm345_vm0, %v705_v10 }
  0x25   :  { %552 = vmatpush.msk.msrb.mxu1 %vm52_vm1, %v705_v10  ;;  %545 = vmatmul.msk.f32.gmra.mxu0 %vm107_vm5, %v104_v21 }
  0x26   :  { %612 = vmatpush.msk.msrb.mxu0 %vm344_vm2, %v705_v10  ;;  %577 = vmatmul.msk.f32.gmra.mxu2 %vm107_vm5, %v217_v22 }
  0x27   :  { %553 = vmatpush.msk.msrb.mxu1 %vm51_vm3, %v705_v10  ;;  %632 = vmatpush.msk.msrb.mxu2 %vm345_vm0, %v705_v10 }
  0x28   :  { %613 = vmatpush.msk.msrb.mxu0 %vm343_vm4, %v705_v10  ;;  %426 = vperm.xlu0 %643, %v416_v31  }
  0x29   :  { %554 = vmatpush.msk.msrb.mxu1 %vm50_vm6, %v705_v10  ;;  %633 = vmatpush.msk.msrb.mxu2 %vm344_vm2, %v705_v10 }
  0x2a   :  { %614 = vmatpush.msk.msrb.mxu0 %vm342_vm7, %v705_v10  ;;  %597 = vmatmul.msk.f32.gmra.mxu3 %vm107_vm5, %v292_v24 }
  0x2b   :  { %555 = vmatpush.msk.msrb.mxu1 %vm49_vm8, %v705_v10  ;;  %634 = vmatpush.msk.msrb.mxu2 %vm343_vm4, %v705_v10 }
  0x2c   :  { %556 = vmatmul.msk.f32.vlgmr.msrb.gmra.mxu1 %vm107_vm5, %v73_v26  ;;  %615 = vmatpush.msk.msrb.mxu0 %vm341_vm9, %v705_v10 }
  0x2d   :  { %616 = vmatmul.msk.f32.vlgmr.msrb.gmra.mxu0 %vm107_vm5, %v366_v27  ;;  %635 = vmatpush.msk.msrb.mxu2 %vm342_vm7, %v705_v10 }
  0x2e   :  { %578 = vmatmul.msk.f32.gmra.mxu2 %vm107_vm5, %v218_v28  ;;  %449 = vperm.xlu1 %644, %v443_v36  }
  0x2f   :  { %636 = vmatpush.msk.msrb.mxu2 %vm341_vm9, %v705_v10  ;;  %436 = vperm.xlu2 %645, %v418_v37  }
  0x30   :  { %459 = vperm.xlu0 %643, %v445_v38  }
  0x32   :  { %598 = vmatmul.msk.f32.gmra.mxu3 %vm107_vm5, %v293_v32 }
  0x34   :  { %557 = vmatmul.msk.f32.gmra.mxu1 %vm107_vm5, %v74_v33 }
  0x35   :  { %617 = vmatmul.msk.f32.gmra.mxu0 %vm107_vm5, %v367_v34 }
  0x36   :  { %579 = vmatmul.msk.f32.gmra.mxu2 %vm107_vm5, %v219_v35  ;;  %464 = vperm.xlu1 %644, %v446_v43  }
  0x3a   :  { %599 = vmatmul.msk.f32.gmra.mxu3 %vm107_vm5, %v294_v39 }
  0x3c   :  { %558 = vmatmul.msk.f32.gmra.mxu1 %vm107_vm5, %v75_v40 }
  0x3d   :  { %618 = vmatmul.msk.f32.gmra.mxu0 %vm107_vm5, %v368_v41  ;;  %v481_v41 = vstv %s1003_s4  ;;  %s510_s4 = sshll.u32 %s1004_s5, 4  ;;  %s511_s4 = int_to_ptr.hbm [resolvable:$true] %s510_s4 }
  0x3e   :  { %619 = vmatmul.msk.f32.vlgmr.msrb.gmra.mxu2 %vm107_vm5, %v369_v42 }
  0x44   :  { %559 = vmatmul.msk.f32.gmra.mxu1 %vm107_vm5, %v76_v44 }
  0x66   :  { %v455_v11 = vpop.permute.xlu2 %454 }
  0x7c   :  { %v432_v62 = vpop.permute.xlu1 %431 }
  0x7d   :  { %v422_v58 = vpop.permute.xlu0 %421 }
  0x89   :  { %v437_v29 = vpop.permute.xlu2 %436 }
  0x99   :  { %v143_v45 = vpop.f32.mrf.mxu1  ;;  %v137_v46 = vpop.f32.mrf.mxu0 }
  0x9a   :  { %v427_v7 = vpop.permute.xlu0 %426 }
  0xa0   :  { %v450_v14 = vpop.permute.xlu1 %449 }
  0xa1   :  { %v146_v47 = vpop.f32.mrf.mxu1  ;;  %v249_v48 = vpop.f32.mrf.mxu2 }
  0xa2   :  { %v140_v49 = vpop.f32.mrf.mxu0  ;;  %v460_v25 = vpop.permute.xlu0 %459 }
  0xa5   :  { %v324_v50 = vpop.f32.mrf.mxu3 }
  0xa8   :  { %v465_v32 = vpop.permute.xlu1 %464 }
  0xa9   :  { %v178_v51 = vpop.f32.mrf.mxu1  ;;  %v252_v52 = vpop.f32.mrf.mxu2 }
  0xaa   :  { %v399_v53 = vpop.f32.mrf.mxu0  ;;  %v179_v60 = vadd.f32 %v178_v51, %v137_v46 }
  0xac   :  { %v261_v63 = vadd.f32 %v249_v48, %v179_v60 }
  0xad   :  { %v327_v54 = vpop.f32.mrf.mxu3 }
  0xae   :  { %v336_v5 = vadd.f32 %v324_v50, %v261_v63 }
  0xb0   :  { %v411_v12 = vadd.f32 %v399_v53, %v336_v5 }
  0xb1   :  { %v181_v55 = vpop.f32.mrf.mxu1  ;;  %v255_v56 = vpop.f32.mrf.mxu2 }
  0xb2   :  { %v182_v57 = vadd.f32 %v181_v55, %v140_v49  ;;  %v402_v59 = vpop.f32.mrf.mxu0  ;;  %v439_v19 = vadd.f32 %v422_v58, %v411_v12 }
  0xb4   :  { %v262_v61 = vadd.f32 %v252_v52, %v182_v57  ;;  %v467_v26 = vmul.f32 %v450_v14, %v439_v19 }
  0xb5   :  { %v330_v1 = vpop.f32.mrf.mxu3 }
  0xb6   :  { %v337_v2 = vadd.f32 %v327_v54, %v262_v61 }
  0xb8   :  { %v412_v9 = vadd.f32 %v402_v59, %v337_v2 }
  0xb9   :  { %v184_v0 = vpop.f32.mrf.mxu1  ;;  %v258_v4 = vpop.f32.mrf.mxu2 }
  0xba   :  { %v185_v3 = vadd.f32 %v184_v0, %v143_v45  ;;  %v405_v8 = vpop.f32.mrf.mxu0  ;;  %v440_v16 = vadd.f32 %v427_v7, %v412_v9 }
  0xbc   :  { %v263_v6 = vadd.f32 %v255_v56, %v185_v3  ;;  %v468_v23 = vmul.f32 %v455_v11, %v440_v16 }
  0xbd   :  { %v333_v18 = vpop.f32.mrf.mxu3 }
  0xbe   :  { %v338_v10 = vadd.f32 %v330_v1, %v263_v6  ;;  %v471_v30 = vadd.f32 %v468_v23, %v467_v26 }
  0xc0   :  { %v413_v13 = vadd.f32 %v405_v8, %v338_v10 }
  0xc1   :  { %v187_v15 = vpop.f32.mrf.mxu1  ;;  %v408_v22 = vpop.f32.mrf.mxu2 }
  0xc2   :  { %v188_v17 = vadd.f32 %v187_v15, %v146_v47  ;;  %v441_v20 = vadd.f32 %v432_v62, %v413_v13 }
  0xc4   :  { %v264_v21 = vadd.f32 %v258_v4, %v188_v17  ;;  %v469_v27 = vmul.f32 %v460_v25, %v441_v20 }
  0xc6   :  { %v339_v24 = vadd.f32 %v333_v18, %v264_v21  ;;  %v472_v33 = vadd.f32 %v471_v30, %v469_v27 }
  0xc8   :  { %v414_v28 = vadd.f32 %v408_v22, %v339_v24 }
  0xca   :  { %v442_v31 = vadd.f32 %v437_v29, %v414_v28 }
  0xcc   :  { %v470_v34 = vmul.f32 %v465_v32, %v442_v31 }
  0xce   :  { %v473_v35 = vadd.f32 %v472_v33, %v470_v34 }
  0xd0   :  { %v474_v36 = vrot.slane %v473_v35, 4 }
  0xd2   :  { %v475_v37 = vadd.f32 %v474_v36, %v473_v35 }
  0xd4   :  { %v476_v38 = vrot.slane %v475_v37, 2 }
  0xd6   :  { %v477_v39 = vadd.f32 %v476_v38, %v475_v37 }
  0xd8   :  { %v478_v40 = vrot.slane %v477_v39, 1 }
  0xda   :  { %v479_v42 = vadd.f32 %v478_v40, %v477_v39 }
  0xdc   :  { %v482_v43 = vadd.f32 %v481_v41, %v479_v42 }
  0xde   :  { %v620_v44 = vmul.f32 -1.442695, %v482_v43 }
  0xe0   :  { %646 = vpow2.f32 %v620_v44 }
  0xe6   :  { %v647_v45 = vpop.eup %646 }
  0xe7   :  { %v486_v46 = vadd.f32 1.0, %v647_v45 }
  0xe9   :  { %648 = vrcp.f32 %v486_v46  ;;  %v498_v50 = vand.u32 2147483648, %v486_v46  ;;  %v496_v52 = vand.u32 2147483647, %v486_v46  ;;  %vm492_vm10 = vweird.f32 %v486_v46 }
  0xeb   :  { %v499_v54 = vor.u32 1.1754944e-38, %v498_v50  ;;  %vm497_vm12 = vcmp.eq.f32.partialorder %v496_v52, 8.507059e+37 }
  0xef   :  { %v649_v47 = vpop.eup %648 }
  0xf0   :  { %v488_v48 = vmul.f32 %v649_v47, %v486_v46  ;;  %vm493_vm5 = vweird.f32 %v649_v47 }
  0xf1   :  { %vm494_vm11 = vmor %vm492_vm10, %vm493_vm5 }
  0xf2   :  { %v489_v49 = vsub.f32 1.0, %v488_v48 }
  0xf4   :  { %v490_v51 = vmul.f32 %v649_v47, %v489_v49 }
  0xf6   :  { %v491_v53 = vadd.f32 %v649_v47, %v490_v51 }
  0xf8   :  { %v495_v55 = vsel %vm494_vm11, %v649_v47, %v491_v53 }
  0xf9   :  { %v500_v56 = vsel %vm497_vm12, %v499_v54, %v495_v55 }
  0xfa   :  { %502 = vst [vmem:[#allocation6] sm:$0x1] %v500_v56 }
  0xfb   :  { %513 = dma.vmem_to_hbm [thread:$0]  %s509_s17, 16, %s511_s4, [#allocation5]  }
  0xfc   :  { %700 = dma.done.wait [#allocation5], 16  }
  0xfd   :  { %701 = vsyncadd [#allocation5], 4294967280 }
  0xfe   :  { %518 = vsyncpa [#allocation4], 1 }
  0xff   :  { %519 = vsyncpa [#allocation5], 1 }

</bundles_post_ra>
